<compile_context>
chip_gen: v5e
topology: v5e:2x2
jax: 0.10.0
libtpu: 0.0.40
codegen_flags: <defaults>
</compile_context>

<pallas_src>
import jax
import jax.numpy as jnp
from jax.experimental import pallas as pl
from jax.experimental.pallas import tpu as pltpu

_MIB = 1024 * 1024
_SMALL_BYPASS_BYTES = 1 * _MIB


def _round_up(a: int, m: int) -> int:
    return ((a + m - 1) // m) * m


def _sublane_pack(dtype) -> int:
    """Sublane packing multiple: 8 for 32-bit, 16 for bf16, 32 for int8."""
    itemsize = jnp.dtype(dtype).itemsize
    return 8 * max(1, 4 // max(1, itemsize))


def _vmem_capacity_bytes() -> int:
    """Physical VMEM per TensorCore, with a per-platform fallback."""
    try:
        return int(pltpu.get_tpu_info().vmem_capacity_bytes)
    except Exception:
        pass
    try:
        kind = jax.devices()[0].device_kind.lower()
    except Exception:
        kind = ""
    if "v7" in kind:
        return 64 * _MIB
    if "v2" in kind or "v3" in kind:
        return 16 * _MIB
    if any(f"v{g}" in kind for g in (4, 5, 6)):
        return 128 * _MIB
    return 64 * _MIB  # conservative default


def _padded_tile_bytes(shape2d, dtype) -> int:
    """Bytes of a (sublane, lane) VMEM tile after (pack, 128) padding."""
    s, l = shape2d
    itemsize = jnp.dtype(dtype).itemsize
    return _round_up(max(1, s), _sublane_pack(dtype)) * _round_up(max(1, l), 128) * itemsize


# ---------------------------------------------------------------------------
# Kernels: everything is either a straight copy or a 2-D minor transpose of
# the current tile (leading size-1 dims are squeezed away via None block dims).
# ---------------------------------------------------------------------------
def _copy_tile_kernel(x_ref, o_ref):
    o_ref[...] = x_ref[...]


def _transpose_tile_kernel(x_ref, o_ref):
    # x_ref: (S, L) -> o_ref: (L, S); single XLU pass, no padded intermediate.
    o_ref[...] = x_ref[...].T


# ---------------------------------------------------------------------------
# Hot paths: 4-D perm (0,2,3,1) (NCHW->NHWC) and (0,3,1,2) (NHWC->NCHW).
# Both become a per-(batch, HW-tile) 2-D transpose between (C, T_HW) and
# (T_HW, C) over free (B, C, HW) <-> (B, HW, C) wrapper reshapes.
# ---------------------------------------------------------------------------
def _choose_hw_tile(hw: int, c: int, dtype, batch: int):
    """Pick an HW tile (multiple of 128 or full HW) from padded VMEM bytes."""
    cap = _vmem_capacity_bytes()
    budget = (cap * 3) // 4  # headroom for pipeline buffers + compute temporary

    def footprint(t):
        in_b = _padded_tile_bytes((c, t), dtype)
        out_b = _padded_tile_bytes((t, c), dtype)
        # 2x double-buffered input + output tiles, plus one transpose temp.
        return 2 * (in_b + out_b) + max(in_b, out_b)

    cands = [t for t in range(128, hw + 1, 128) if hw % t == 0]
    if hw not in cands:
        cands.append(hw)
    if batch == 1:
        # v7x megacore: keep >= 2 grid blocks so both TensorCores get work.
        multi = [t for t in cands if t < hw]
        if multi:
            cands = multi
    fitting = [t for t in cands if footprint(t) <= budget]
    t = max(fitting) if fitting else min(cands)
    return t, footprint(t), cap


def _hw_transpose_call(x3, out_shape3, in_block, in_map, out_block, out_map,
                       grid, footprint, cap):
    vmem_limit = int(min((cap * 7) // 8, max(2 * footprint, 16 * _MIB)))
    return pl.pallas_call(
        _transpose_tile_kernel,
        out_shape=jax.ShapeDtypeStruct(out_shape3, x3.dtype),
        grid=grid,
        in_specs=[pl.BlockSpec(in_block, in_map)],
        out_specs=pl.BlockSpec(out_block, out_map),
        compiler_params=pltpu.CompilerParams(
            dimension_semantics=("parallel", "parallel"),
            vmem_limit_bytes=vmem_limit,
        ),
    )(x3)


def _permute_nchw_to_nhwc(x: jax.Array) -> jax.Array:
    # TODO(synk): for very small C (<8) a lane-dense (TH, W*C) output slab and
    # bf16/int8 u32 pair-packing would further improve v5e store throughput.
    b, c, h, w = x.shape
    hw = h * w
    t, fp, cap = _choose_hw_tile(hw, c, x.dtype, b)
    if fp > (cap * 7) // 8:
        # TODO(synk): ragged HW tiling when HW has no 128-multiple divisor and
        # the full (C, HW) plane exceeds VMEM.
        return jnp.transpose(x, (0, 2, 3, 1))
    x3 = jnp.reshape(x, (b, c, hw))                     # free row-major reshape
    out3 = _hw_transpose_call(
        x3, (b, hw, c),
        in_block=(None, c, t), in_map=lambda bi, ti: (bi, 0, ti),
        out_block=(None, t, c), out_map=lambda bi, ti: (bi, ti, 0),
        grid=(b, hw // t), footprint=fp, cap=cap)
    return jnp.reshape(out3, (b, h, w, c))              # free row-major reshape


def _permute_nhwc_to_nchw(x: jax.Array) -> jax.Array:
    b, h, w, c = x.shape
    hw = h * w
    t, fp, cap = _choose_hw_tile(hw, c, x.dtype, b)
    if fp > (cap * 7) // 8:
        return jnp.transpose(x, (0, 3, 1, 2))
    x3 = jnp.reshape(x, (b, hw, c))                     # free row-major reshape
    out3 = _hw_transpose_call(
        x3, (b, c, hw),
        in_block=(None, t, c), in_map=lambda bi, ti: (bi, ti, 0),
        out_block=(None, c, t), out_map=lambda bi, ti: (bi, 0, ti),
        grid=(b, hw // t), footprint=fp, cap=cap)
    return jnp.reshape(out3, (b, c, h, w))              # free row-major reshape


# ---------------------------------------------------------------------------
# Generic permutations that keep the two minor axes (in order or swapped):
# all movement of leading axes is done at grid level via index_maps, and the
# kernel is a copy (minor axes unchanged) or a 2-D transpose (minor swap).
# ---------------------------------------------------------------------------
def _permute_keep_minor(x: jax.Array, perm, swap_minor: bool) -> jax.Array:
    n = x.ndim
    out_shape = tuple(x.shape[p] for p in perm)
    s, l = x.shape[-2], x.shape[-1]
    lead_out = out_shape[:-2]
    pos_of = {perm[j]: j for j in range(n - 2)}  # input leading axis -> output position

    cap = _vmem_capacity_bytes()
    plane_in = _padded_tile_bytes((s, l), x.dtype)
    plane_out = _padded_tile_bytes((l, s) if swap_minor else (s, l), x.dtype)
    footprint = 2 * (plane_in + plane_out) + max(plane_in, plane_out)
    if footprint > (cap * 7) // 8:
        # TODO(synk): tile the minor (S, L) plane when it alone exceeds VMEM.
        return jnp.transpose(x, perm)

    pad = 0 if lead_out else 1
    grid = lead_out if lead_out else (1,)

    def in_map(*idx):
        idx = idx[pad:]
        return tuple(idx[pos_of[a]] for a in range(n - 2)) + (0, 0)

    def out_map(*idx):
        idx = idx[pad:]
        return tuple(idx) + (0, 0)

    in_block = (None,) * (n - 2) + (s, l)
    out_block = (None,) * (n - 2) + ((l, s) if swap_minor else (s, l))
    kernel = _transpose_tile_kernel if swap_minor else _copy_tile_kernel
    vmem_limit = int(min((cap * 7) // 8, max(2 * footprint, 16 * _MIB)))

    return pl.pallas_call(
        kernel,
        out_shape=jax.ShapeDtypeStruct(out_shape, x.dtype),
        grid=grid,
        in_specs=[pl.BlockSpec(in_block, in_map)],
        out_specs=pl.BlockSpec(out_block, out_map),
        compiler_params=pltpu.CompilerParams(
            dimension_semantics=("parallel",) * len(grid),
            vmem_limit_bytes=vmem_limit,
        ),
    )(x)


# ---------------------------------------------------------------------------
# Dispatch
# ---------------------------------------------------------------------------
def pallas_permute(x: jax.Array, perm, *, force_pallas: bool = False) -> jax.Array:
    """Equivalent of torch.Tensor.permute(*perm), implemented with Pallas."""
    perm = tuple(int(p) for p in perm)
    n = x.ndim
    assert len(perm) == n
    assert sorted(perm) == list(range(n))

    if perm == tuple(range(n)):                 # identity permute
        return x

    nbytes = x.size * jnp.dtype(x.dtype).itemsize
    if not force_pallas and nbytes < _SMALL_BYPASS_BYTES:
        # Small-tensor bypass: launch + per-grid-step overhead dominates.
        return jnp.transpose(x, perm)

    if n == 4 and perm == (0, 2, 3, 1):         # NCHW -> NHWC (hot path)
        return _permute_nchw_to_nhwc(x)
    if n == 4 and perm == (0, 3, 1, 2):         # NHWC -> NCHW (hot path)
        return _permute_nhwc_to_nchw(x)
    if n >= 2 and perm[-1] == n - 1 and perm[-2] == n - 2:
        return _permute_keep_minor(x, perm, swap_minor=False)
    if n >= 2 and perm[-1] == n - 2 and perm[-2] == n - 1:
        return _permute_keep_minor(x, perm, swap_minor=True)

    # TODO(synk): exotic permutations that move a minor axis to a major
    # position (other than NCHW<->NHWC) fall back to XLA's native transpose.
    return jnp.transpose(x, perm)


class Permute:
    """Mirror of the PyTorch nn.Module: stores the permutation, applies it."""

    def __init__(self, *args: int):
        self.args = tuple(args)

    def __call__(self, x: jax.Array) -> jax.Array:
        return pallas_permute(x, self.args)


if __name__ == "__main__":
    key = jax.random.PRNGKey(0)
    k1, k2 = jax.random.split(key)

    # Small NCHW input consistent with the module's typical usage in VMamba.
    x = jax.random.normal(k1, (2, 4, 16, 16), dtype=jnp.float32)

    # 1) Hot path: Permute(0, 2, 3, 1)  (NCHW -> NHWC), Pallas path forced.
    y = jax.block_until_ready(pallas_permute(x, (0, 2, 3, 1), force_pallas=True))
    y_ref = jnp.transpose(x, (0, 2, 3, 1))
    assert y.shape == (2, 16, 16, 4) and y.dtype == x.dtype
    assert bool(jnp.array_equal(y, y_ref))

    # 2) Inverse hot path: Permute(0, 3, 1, 2)  (NHWC -> NCHW), round-trips.
    z = jax.block_until_ready(pallas_permute(y, (0, 3, 1, 2), force_pallas=True))
    assert z.shape == x.shape and bool(jnp.array_equal(z, x))

    # 3) B == 1 exercises the multi-HW-tile grid (keeps both v7x TCs busy).
    xb1 = jax.random.normal(k2, (1, 8, 16, 16), dtype=jnp.float32)
    yb1 = jax.block_until_ready(pallas_permute(xb1, (0, 2, 3, 1), force_pallas=True))
    assert bool(jnp.array_equal(yb1, jnp.transpose(xb1, (0, 2, 3, 1))))

    # 4) Leading-axes-only permutation -> grid-level copy kernel.
    w = jax.block_until_ready(pallas_permute(x, (1, 0, 2, 3), force_pallas=True))
    assert bool(jnp.array_equal(w, jnp.transpose(x, (1, 0, 2, 3))))

    # 5) Minor-axis swap -> grid-level 2-D transpose kernel.
    v = jax.block_until_ready(pallas_permute(x, (0, 1, 3, 2), force_pallas=True))
    assert bool(jnp.array_equal(v, jnp.transpose(x, (0, 1, 3, 2))))

    # 6) Module API, matching the torch usage (small inputs take the bypass).
    m = Permute(0, 2, 3, 1)
    assert bool(jnp.array_equal(jax.block_until_ready(m(x)), y_ref))

    print("KERNEL_OK")
</pallas_src>

<mosaic_0001>
module attributes {stable_mosaic.version = 11 : i64} {
  func.func @_transpose_tile_kernel(%arg0: i32, %arg1: i32, %arg2: memref<1x4x256xf32, #tpu.memory_space<vmem>>, %arg3: memref<1x256x4xf32, #tpu.memory_space<vmem>>) attributes {dimension_semantics = [#tpu.dimension_semantics<parallel>, #tpu.dimension_semantics<parallel>], iteration_bounds = array<i64: 2, 1>, scalar_prefetch = 0 : i64, scratch_operands = 0 : i64, tpu.core_type = #tpu.core_type<tc>, window_params = [{transform_indices = @transform_0, window_bounds = array<i64: 1, 4, 256>}, {transform_indices = @transform_1, window_bounds = array<i64: 1, 256, 4>}]} {
    %c0 = arith.constant 0 : index
    %c0_0 = arith.constant 0 : index
    %c0_1 = arith.constant 0 : index
    %0 = vector.load %arg2[%c0, %c0_0, %c0_1] : memref<1x4x256xf32, #tpu.memory_space<vmem>>, vector<1x4x256xf32>
    %1 = vector.shape_cast %0 : vector<1x4x256xf32> to vector<4x256xf32>
    %2 = tpu.transpose %1, [1, 0] : vector<4x256xf32> -> vector<256x4xf32>
    %c0_2 = arith.constant 0 : index
    %c0_3 = arith.constant 0 : index
    %c0_4 = arith.constant 0 : index
    %3 = vector.load %arg3[%c0_2, %c0_3, %c0_4] : memref<1x256x4xf32, #tpu.memory_space<vmem>>, vector<1x256x4xf32>
    %4 = vector.shape_cast %3 : vector<1x256x4xf32> to vector<256x4xf32>
    %5 = vector.shape_cast %2 : vector<256x4xf32> to vector<1x256x4xf32>
    tpu.vector_store %arg3[%c0_2, %c0_3, %c0_4], %5 {strides = array<i32>} : memref<1x256x4xf32, #tpu.memory_space<vmem>>, vector<1x256x4xf32>,
    return
  }
  func.func @transform_0(%arg0: i32, %arg1: i32) -> (i32, i32, i32) {
    %c0_i32 = arith.constant 0 : i32
    %c0_i32_0 = arith.constant 0 : i32
    return %arg0, %c0_i32, %arg1 : i32, i32, i32
  }
  func.func @transform_1(%arg0: i32, %arg1: i32) -> (i32, i32, i32) {
    %c0_i32 = arith.constant 0 : i32
    %c0_i32_0 = arith.constant 0 : i32
    return %arg0, %arg1, %c0_i32 : i32, i32, i32
  }
}

</mosaic_0001>

<bundles_post_ra>
// kernel: tpu_custom_call.1
= control target key start
LH: loop header
LB: loop body
LE: loop exit
PB: predicated region body
PF: predicated region fallthrough
CT: control target
= control target key end

     0   :  { %6 = vsyncpa [#allocation3], 0  ;;  %s681_s0 = inlined_call_operand.hbm [shape: f32[2,4,256], index: 0, kind: input, shape index: {}]   ;;  %s682_s1 = inlined_call_operand.vmem [shape: f32[2,256,4], index: 1, kind: output, shape index: {}]  }
   0x1   :  { %8 = vsyncpa [#allocation3 + $0x1], 0  ;;  %s527_s6 = smov 0   ;;  %s529_s7 = smov 0  }
   0x2   :  { %s531_s8 = smov 0   ;;  %s533_s9 = smov 0  }
   0x3   :  { %s535_s10 = smov 0   ;;  %s537_s11 = smov 0  }
   0x4 LB: > { %s364_s12 = sadd.s32 4294967295, %s515_s11   ;;  %s26_s13 = sadd.s32 1, %s511_s10  ;;  %s515_s11 = sphi %s537_s11, %s14_s11   ;;  %s511_s10 = sphi %s535_s10, %s689_s10   ;;  %s507_s9 = sphi %s533_s9, %s688_s9   ;;  %s503_s8 = sphi %s531_s8, %s687_s8   ;;  %s499_s7 = sphi %s529_s7, %s686_s7   ;;  %s495_s6 = sphi %s527_s6, %s685_s6  }
   0x5   : > { %p28_p0 = scmp.ge.s32.totalorder %s26_s13, 2  ;;  %s35_s14 = sadd.s32 1, %s503_s8 }
   0x6   : > { %p42_p1 = scmp.ne.s32.totalorder %s503_s8, %s499_s7  ;;  %p43_p2 = scmp.eq.s32.totalorder %s515_s11, 0 }
   0x7   : > { %s691_s13 = smov (%p28_p0, %s26_s13), 0  ;;  %p48_p4 = scmp.ne.s32.totalorder %s499_s7, %s495_s6 }
   0x8   : > { %p563_p3 = por %p43_p2, %p42_p1  ;;  %s30_s16 = ssub.s32 %s511_s10, %s691_s13 }
   0x9   : > { %p49_p5 = scmp.eq.s32.totalorder %s364_s12, 0  ;;  %p33_p6 = scmp.eq.s32.totalorder %s30_s16, 0 }
   0xa   : > { %p385_p8 = scmp.lt.s32.totalorder %s515_s11, 2  ;;  %s100_s19 = sand.u32 1, %s503_s8  }
   0xb   : > { %p570_p7 = por %p49_p5, %p48_p4  ;;  %s377_s20 = sshll.u32 %s511_s10, 3 }
   0xc   : > { %s576_s18 = scalar_select %p33_p6, %s503_s8, %s35_s14  }
   0xd   : > { %s368_s21 = sshll.u32 %s100_s19, 3  ;;  %s111_s24 = scalar_lea.hbm %s681_s0, %s377_s20 }
   0xe   : > { %s113_s25 = sshll.u32 %s111_s24, 4  ;;  %s104_s26 = scalar_lea.vmem [#allocation2], %s368_s21  ;;  %s114_s25 = int_to_ptr.hbm [resolvable:$true] %s113_s25 }
   0xf   : > { %s115_s27 = sshll.u32 %s104_s26, 4  ;;  %p382_p9 = pnand %p385_p8, %p563_p3  ;;  %s116_s27 = int_to_ptr.vmem [resolvable:$true] %s115_s27 }
  0x10   : > { %p371_p10 = scmp.ge.s32.totalorder %s515_s11, 1  ;;  %p120_p11 = scmp.lt.s32.totalorder %s515_s11, 3 }
  0x11   : > { %s101_s28 = scalar_lea.sflag [#allocation3], %s100_s19 }
  0x12   : > { %384 = dma.hbm_to_vmem [thread:$0]  (!%p382_p9), %s114_s25, 128, %s116_s27, %s101_s28  }
  0x13   : > { %p121_p12 = pnand %p371_p10, %p120_p11 }
  0x14   : > { %s126_s29 = sand.u32 (!%p121_p12), 1, %s499_s7  }
  0x15   : > { %124 = sbr.rel (%p121_p12) target bundleno = 450 (0x1c2), region = 24  ;;  %s372_s30 = sshll.u32 (!%p121_p12), %s126_s29, 3 }
  0x16   : > { %s127_s2 = scalar_lea.sflag (!%p121_p12), [#allocation3], %s126_s29  ;;  %s130_s3 = scalar_lea.vmem (!%p121_p12), [#allocation2], %s372_s30 }
  0x1a   : > { %490 = dma.done.wait (%p570_p7), %s127_s2, 128  }
  0x1b   : > { %492 = vsyncadd (%p570_p7), %s127_s2, 4294967168  ;;  %v165_v0 = vld [vmem:[%s130_s3] sm:$0xff]  ;;  %p156_p13 = scmp.lt.s32.totalorder %s507_s9, 1  ;;  %vm236_vm0 = vcmask 31744  }
  0x1c   : > { %167 = vst [vmem:[#allocation1] ss:$2 sm:$0xff] %v165_v0 }
  0x1d   : > { %s693_s9 = smov (!%p156_p13, %s507_s9), 1 }
  0x1e   : > { %s378_s4 = sshll.u32 %s693_s9, 8 }
  0x1f   : > { %s597_s12 = scalar_lea.vmem %s682_s1, %s378_s4 }
  0x23   : > { %v168_v1 = vld.sshfl [vmem:[#allocation1] sm:$0xff pattern:$0x75316420]  ;;  %v169_v2 = vld.sshfl [vmem:[#allocation1 + $0x8] sm:$0xff pattern:$0x75316420] }
  0x24   : > { %172 = vxpose.xlu0.b32.start.end [1/1] (short) %v168_v1, 128 }
  0xa4   : > { %204 = vxpose.xlu0.b32.start.end [1/1] (short) %v169_v2, 128 }
  0xc8   : > { %v188_v3 = vpop.trf.xlu0 }
  0xc9   : > { %237 = vst.msk [vmem:[%s597_s12] sm:$0xff] %vm236_vm0, %v188_v3 }
  0xd0   : > { %v189_v4 = vpop.trf.xlu0 }
  0xd1   : > { %238 = vst.msk [vmem:[%s597_s12 + $0x8] sm:$0xff] %vm236_vm0, %v189_v4 }
  0xd8   : > { %v190_v5 = vpop.trf.xlu0 }
  0xd9   : > { %239 = vst.msk [vmem:[%s597_s12 + $0x10] sm:$0xff] %vm236_vm0, %v190_v5 }
  0xe0   : > { %v191_v6 = vpop.trf.xlu0 }
  0xe1   : > { %240 = vst.msk [vmem:[%s597_s12 + $0x18] sm:$0xff] %vm236_vm0, %v191_v6 }
  0xe8   : > { %v192_v7 = vpop.trf.xlu0 }
  0xe9   : > { %241 = vst.msk [vmem:[%s597_s12 + $0x20] sm:$0xff] %vm236_vm0, %v192_v7 }
  0xf0   : > { %v193_v8 = vpop.trf.xlu0 }
  0xf1   : > { %242 = vst.msk [vmem:[%s597_s12 + $0x28] sm:$0xff] %vm236_vm0, %v193_v8 }
  0xf8   : > { %v194_v9 = vpop.trf.xlu0 }
  0xf9   : > { %243 = vst.msk [vmem:[%s597_s12 + $0x30] sm:$0xff] %vm236_vm0, %v194_v9 }
 0x100   : > { %v195_v10 = vpop.trf.xlu0 }
 0x101   : > { %244 = vst.msk [vmem:[%s597_s12 + $0x38] sm:$0xff] %vm236_vm0, %v195_v10 }
 0x108   : > { %v196_v11 = vpop.trf.xlu0 }
 0x109   : > { %245 = vst.msk [vmem:[%s597_s12 + $0x40] sm:$0xff] %vm236_vm0, %v196_v11 }
 0x110   : > { %v197_v12 = vpop.trf.xlu0 }
 0x111   : > { %246 = vst.msk [vmem:[%s597_s12 + $0x48] sm:$0xff] %vm236_vm0, %v197_v12 }
 0x118   : > { %v198_v13 = vpop.trf.xlu0 }
 0x119   : > { %247 = vst.msk [vmem:[%s597_s12 + $0x50] sm:$0xff] %vm236_vm0, %v198_v13 }
 0x120   : > { %v199_v14 = vpop.trf.xlu0 }
 0x121   : > { %248 = vst.msk [vmem:[%s597_s12 + $0x58] sm:$0xff] %vm236_vm0, %v199_v14 }
 0x128   : > { %v200_v15 = vpop.trf.xlu0 }
 0x129   : > { %249 = vst.msk [vmem:[%s597_s12 + $0x60] sm:$0xff] %vm236_vm0, %v200_v15 }
 0x130   : > { %v201_v16 = vpop.trf.xlu0 }
 0x131   : > { %250 = vst.msk [vmem:[%s597_s12 + $0x68] sm:$0xff] %vm236_vm0, %v201_v16 }
 0x138   : > { %v202_v17 = vpop.trf.xlu0 }
 0x139   : > { %251 = vst.msk [vmem:[%s597_s12 + $0x70] sm:$0xff] %vm236_vm0, %v202_v17 }
 0x140   : > { %v203_v18 = vpop.trf.xlu0 }
 0x141   : > { %252 = vst.msk [vmem:[%s597_s12 + $0x78] sm:$0xff] %vm236_vm0, %v203_v18 }
 0x148   : > { %v220_v19 = vpop.trf.xlu0 }
 0x149   : > { %253 = vst.msk [vmem:[%s597_s12 + $0x80] sm:$0xff] %vm236_vm0, %v220_v19 }
 0x150   : > { %v221_v20 = vpop.trf.xlu0 }
 0x151   : > { %254 = vst.msk [vmem:[%s597_s12 + $0x88] sm:$0xff] %vm236_vm0, %v221_v20 }
 0x158   : > { %v222_v21 = vpop.trf.xlu0 }
 0x159   : > { %255 = vst.msk [vmem:[%s597_s12 + $0x90] sm:$0xff] %vm236_vm0, %v222_v21 }
 0x160   : > { %v223_v22 = vpop.trf.xlu0 }
 0x161   : > { %256 = vst.msk [vmem:[%s597_s12 + $0x98] sm:$0xff] %vm236_vm0, %v223_v22 }
 0x168   : > { %v224_v23 = vpop.trf.xlu0 }
 0x169   : > { %257 = vst.msk [vmem:[%s597_s12 + $0xa0] sm:$0xff] %vm236_vm0, %v224_v23 }
 0x170   : > { %v225_v24 = vpop.trf.xlu0 }
 0x171   : > { %258 = vst.msk [vmem:[%s597_s12 + $0xa8] sm:$0xff] %vm236_vm0, %v225_v24 }
 0x178   : > { %v226_v25 = vpop.trf.xlu0 }
 0x179   : > { %259 = vst.msk [vmem:[%s597_s12 + $0xb0] sm:$0xff] %vm236_vm0, %v226_v25 }
 0x180   : > { %v227_v26 = vpop.trf.xlu0 }
 0x181   : > { %260 = vst.msk [vmem:[%s597_s12 + $0xb8] sm:$0xff] %vm236_vm0, %v227_v26 }
 0x188   : > { %v228_v27 = vpop.trf.xlu0 }
 0x189   : > { %261 = vst.msk [vmem:[%s597_s12 + $0xc0] sm:$0xff] %vm236_vm0, %v228_v27 }
 0x190   : > { %v229_v28 = vpop.trf.xlu0 }
 0x191   : > { %262 = vst.msk [vmem:[%s597_s12 + $0xc8] sm:$0xff] %vm236_vm0, %v229_v28 }
 0x198   : > { %v230_v29 = vpop.trf.xlu0 }
 0x199   : > { %263 = vst.msk [vmem:[%s597_s12 + $0xd0] sm:$0xff] %vm236_vm0, %v230_v29 }
 0x1a0   : > { %v231_v30 = vpop.trf.xlu0 }
 0x1a1   : > { %264 = vst.msk [vmem:[%s597_s12 + $0xd8] sm:$0xff] %vm236_vm0, %v231_v30 }
 0x1a8   : > { %v232_v31 = vpop.trf.xlu0 }
 0x1a9   : > { %265 = vst.msk [vmem:[%s597_s12 + $0xe0] sm:$0xff] %vm236_vm0, %v232_v31 }
 0x1b0   : > { %v233_v32 = vpop.trf.xlu0 }
 0x1b1   : > { %266 = vst.msk [vmem:[%s597_s12 + $0xe8] sm:$0xff] %vm236_vm0, %v233_v32 }
 0x1b8   : > { %v234_v33 = vpop.trf.xlu0 }
 0x1b9   : > { %267 = vst.msk [vmem:[%s597_s12 + $0xf0] sm:$0xff] %vm236_vm0, %v234_v33 }
 0x1c0   : > { %v235_v34 = vpop.trf.xlu0 }
 0x1c1   : > { %268 = vst.msk [vmem:[%s597_s12 + $0xf8] sm:$0xff] %vm236_vm0, %v235_v34 }
 0x1c2 PF: > { %s14_s11 = sadd.s32 1, %s515_s11   ;;  %s685_s6 = smov %s499_s7 }
 0x1c3   : > { %p11_p0 = scmp.ge.s32.totalorder %s14_s11, 4   ;;  %s686_s7 = smov %s503_s8 }
 0x1c4   : > { %s687_s8 = smov %s576_s18  ;;  %s688_s9 = smov %s511_s10 }
 0x1c5   : > { %s689_s10 = smov %s691_s13  ;;  %13 = sbr.rel (!%p11_p0) target bundleno = 4 (0x4), region = 64 }
 0x1ca   :  { %299 = vsyncpa [#allocation3], 1 }
 0x1cb   :  { %301 = vsyncpa [#allocation3 + $0x1], 1 }

</bundles_post_ra>
